<compile_context>
chip_gen: v5e
topology: v5e:2x2
jax: 0.10.0
libtpu: 0.0.40
codegen_flags: <defaults>
</compile_context>

<pallas_src>
import functools

import jax
import jax.numpy as jnp
from jax.experimental import pallas as pl
from jax.experimental.pallas import tpu as pltpu


# ----------------------------- Pallas kernel --------------------------------
def cifar_kernel(patches_t_ref, wconv_t_ref, bconv_ref, wcls_t_ref, bcls_ref,
                 out_ref, *, batch, hw):
    # patches_t_ref : [Kpad, B*HW]  bf16   (lane-dense: B*HW % 128 == 0)
    # wconv_t_ref   : [Cout, Kpad]  bf16
    # bconv_ref     : [Cout, 1]     f32
    # wcls_t_ref    : [Npad, Cout]  f32    (classifier weight^T, zero-padded rows)
    # bcls_ref      : [Npad, 1]     f32
    # out_ref       : [Npad, B]     f32    (logits^T; transposed/sliced in the wrapper)

    # Conv2d(3x3, pad=1) as one lane-dense im2col matmul on the MXU (f32 accumulate).
    conv_t = jnp.dot(wconv_t_ref[...], patches_t_ref[...],
                     preferred_element_type=jnp.float32)            # [Cout, B*HW]
    cout = conv_t.shape[0]

    # Global spatial max-pool per image: lane reduction over each HW segment,
    # assembled into a [Cout, B] tile via iota/select (no in-kernel transposes).
    lane_idx = jax.lax.broadcasted_iota(jnp.int32, (cout, batch), 1)
    pooled_t = jnp.zeros((cout, batch), jnp.float32)
    for b in range(batch):                       # static, tiny B
        seg_max = jnp.max(conv_t[:, b * hw:(b + 1) * hw], axis=1, keepdims=True)
        pooled_t = jnp.where(lane_idx == b, seg_max, pooled_t)

    # Bias + ReLU after the max (ReLU(x + b) is monotone in x, so this is exact).
    act_t = jnp.maximum(pooled_t + bconv_ref[...], 0.0)             # [Cout, B]

    # Classifier: one batched dot for the whole batch.
    logits_t = jnp.dot(wcls_t_ref[...], act_t,
                       preferred_element_type=jnp.float32)          # [Npad, B]
    out_ref[...] = logits_t + bcls_ref[...]


# ------------------------------ wrapper --------------------------------------
def _round_up(x, m):
    return (x + m - 1) // m * m


def _im2col_3x3_t(x_nhwc):
    """[B,H,W,C] -> patches^T [9*C, B*H*W] for a 3x3 / pad=1 conv (wrapper glue)."""
    B, H, W, C = x_nhwc.shape
    xp = jnp.pad(x_nhwc, ((0, 0), (1, 1), (1, 1), (0, 0)))
    cols = [xp[:, dy:dy + H, dx:dx + W, :] for dy in range(3) for dx in range(3)]
    p = jnp.stack(cols, axis=0)                   # [9, B, H, W, C]
    p = jnp.transpose(p, (0, 4, 1, 2, 3))         # [9, C, B, H, W] -> rows ordered (dy,dx,ci)
    return p.reshape(9 * C, B * H * W)


def cifar_forward(x_nchw, w_conv, b_conv, w_cls, b_cls):
    """x_nchw: [B,Cin,H,W] (PyTorch layout); w_conv: [3,3,Cin,Cout] HWIO. -> [B, num_classes]."""
    B, Cin, H, W = x_nchw.shape
    Cout = w_conv.shape[-1]
    num_classes = w_cls.shape[-1]
    HW = H * W
    K = 9 * Cin
    Kpad = _round_up(K, 8)                 # pad contraction dim to a sublane multiple
    Npad = _round_up(num_classes, 128)     # lane-dense classifier dim (no ragged 10-wide tiles)

    x_nhwc = jnp.transpose(x_nchw, (0, 2, 3, 1)).astype(jnp.float32)

    # TODO(synk): im2col stays wrapper-side glue; at real CIFAR scale (large B/H) move
    # patch extraction in-kernel (DMA padded NHWC tile, shifted views) to kill the 9x HBM blowup.
    patches_t = _im2col_3x3_t(x_nhwc)                                    # [K, B*HW]
    patches_t = jnp.pad(patches_t, ((0, Kpad - K), (0, 0))).astype(jnp.bfloat16)

    wconv_t = jnp.transpose(w_conv.reshape(K, Cout))                     # [Cout, K]
    wconv_t = jnp.pad(wconv_t, ((0, 0), (0, Kpad - K))).astype(jnp.bfloat16)
    bconv_col = b_conv.reshape(Cout, 1).astype(jnp.float32)

    wcls_t = jnp.pad(jnp.transpose(w_cls).astype(jnp.float32),
                     ((0, Npad - num_classes), (0, 0)))                  # [Npad, Cout]
    bcls_col = jnp.pad(b_cls.reshape(num_classes, 1).astype(jnp.float32),
                       ((0, Npad - num_classes), (0, 0)))                # [Npad, 1]

    kernel = functools.partial(cifar_kernel, batch=B, hw=HW)

    logits_t = pl.pallas_call(
        kernel,
        out_shape=jax.ShapeDtypeStruct((Npad, B), jnp.float32),
        grid_spec=pltpu.PrefetchScalarGridSpec(
            num_scalar_prefetch=0,
            grid=(1,),                                # whole problem in one pipelined step
            in_specs=[
                pl.BlockSpec((Kpad, B * HW), lambda i: (0, 0)),
                pl.BlockSpec((Cout, Kpad), lambda i: (0, 0)),
                pl.BlockSpec((Cout, 1), lambda i: (0, 0)),
                pl.BlockSpec((Npad, Cout), lambda i: (0, 0)),
                pl.BlockSpec((Npad, 1), lambda i: (0, 0)),
            ],
            out_specs=pl.BlockSpec((Npad, B), lambda i: (0, 0)),
        ),
        compiler_params=pltpu.CompilerParams(
            dimension_semantics=("arbitrary",)),
    )(patches_t, wconv_t, bconv_col, wcls_t, bcls_col)

    # logits^T [Npad, B] -> [B, num_classes]  (tiny fix-up in XLA outside the kernel)
    return jnp.transpose(logits_t)[:, :num_classes]


# ----------------------------- reference (pure JAX, f32) ----------------------
def cifar_reference(x_nchw, w_conv, b_conv, w_cls, b_cls):
    x_nhwc = jnp.transpose(x_nchw, (0, 2, 3, 1)).astype(jnp.float32)
    conv = jax.lax.conv_general_dilated(
        x_nhwc, w_conv, window_strides=(1, 1), padding="SAME",
        dimension_numbers=("NHWC", "HWIO", "NHWC"))
    conv = jnp.maximum(conv + b_conv, 0.0)
    pooled = jnp.max(conv, axis=(1, 2))           # global max pool -> [B, Cout]
    return pooled @ w_cls + b_cls


# --------------------------------- main ---------------------------------------
if __name__ == "__main__":
    B, Cin, H, W = 2, 4, 16, 16      # input:  [2, 4, 16, 16] NCHW
    n_channel = 32                   # conv output channels == classifier input dim
    num_classes = 10

    key = jax.random.PRNGKey(0)
    k_x, k_wc, k_bc, k_wl, k_bl = jax.random.split(key, 5)

    x = jax.random.normal(k_x, (B, Cin, H, W), dtype=jnp.float32)
    w_conv = jax.random.normal(k_wc, (3, 3, Cin, n_channel), dtype=jnp.float32) * 0.1
    b_conv = jax.random.normal(k_bc, (n_channel,), dtype=jnp.float32) * 0.1
    w_cls = jax.random.normal(k_wl, (n_channel, num_classes), dtype=jnp.float32) * 0.1
    b_cls = jax.random.normal(k_bl, (num_classes,), dtype=jnp.float32) * 0.1

    out = cifar_forward(x, w_conv, b_conv, w_cls, b_cls)
    out = jax.block_until_ready(out)

    ref = cifar_reference(x, w_conv, b_conv, w_cls, b_cls)
    assert out.shape == (B, num_classes), out.shape
    # Conv matmul operands are bf16 (f32 accumulation) -> loosened tolerance vs f32 reference.
    assert jnp.allclose(out, ref, rtol=2e-2, atol=5e-2), (
        f"max abs err {jnp.max(jnp.abs(out - ref))}")

    print("KERNEL_OK")
</pallas_src>

<mosaic_0001>
module attributes {stable_mosaic.version = 11 : i64} {
  func.func @cifar_kernel(%arg0: i32, %arg1: memref<40x512xbf16, #tpu.memory_space<vmem>>, %arg2: memref<32x40xbf16, #tpu.memory_space<vmem>>, %arg3: memref<32x1xf32, #tpu.memory_space<vmem>>, %arg4: memref<128x32xf32, #tpu.memory_space<vmem>>, %arg5: memref<128x1xf32, #tpu.memory_space<vmem>>, %arg6: memref<128x2xf32, #tpu.memory_space<vmem>>) attributes {dimension_semantics = [#tpu.dimension_semantics<arbitrary>], iteration_bounds = array<i64: 1>, scalar_prefetch = 0 : i64, scratch_operands = 0 : i64, tpu.core_type = #tpu.core_type<tc>, window_params = [{pipeline_mode = #tpu.pipeline_mode<synchronous>, transform_indices = @transform_0, window_bounds = array<i64: 40, 512>}, {pipeline_mode = #tpu.pipeline_mode<synchronous>, transform_indices = @transform_1, window_bounds = array<i64: 32, 40>}, {pipeline_mode = #tpu.pipeline_mode<synchronous>, transform_indices = @transform_2, window_bounds = array<i64: 32, 1>}, {pipeline_mode = #tpu.pipeline_mode<synchronous>, transform_indices = @transform_3, window_bounds = array<i64: 128, 32>}, {pipeline_mode = #tpu.pipeline_mode<synchronous>, transform_indices = @transform_4, window_bounds = array<i64: 128, 1>}, {pipeline_mode = #tpu.pipeline_mode<synchronous>, transform_indices = @transform_5, window_bounds = array<i64: 128, 2>}]} {
    %c0 = arith.constant 0 : index
    %c0_0 = arith.constant 0 : index
    %0 = vector.load %arg2[%c0, %c0_0] : memref<32x40xbf16, #tpu.memory_space<vmem>>, vector<32x40xbf16>
    %c0_1 = arith.constant 0 : index
    %c0_2 = arith.constant 0 : index
    %1 = vector.load %arg1[%c0_1, %c0_2] : memref<40x512xbf16, #tpu.memory_space<vmem>>, vector<40x512xbf16>
    %cst = arith.constant dense<0.000000e+00> : vector<32x512xf32>
    %2 = tpu.matmul %0, %1, %cst {dimension_numbers = #tpu.dot_dimension_numbers<[1], [0], [0], [1], [0, 0, 1, 1], [], []>} : vector<32x40xbf16>, vector<40x512xbf16>, vector<32x512xf32> -> vector<32x512xf32>
    %3 = tpu.iota {dimensions = array<i32: 1>} : vector<32x2xi32>
    %cst_3 = arith.constant 0.000000e+00 : f32
    %4 = vector.broadcast %cst_3 : f32 to vector<32x2xf32>
    %5 = vector.extract_strided_slice %2 {offsets = [0, 0], sizes = [32, 256], strides = [1, 1]} : vector<32x512xf32> to vector<32x256xf32>
    %cst_4 = arith.constant dense<0xFF800000> : vector<32xf32>
    %6 = vector.multi_reduction <maximumf>, %5, %cst_4 [1] : vector<32x256xf32> to vector<32xf32>
    %7 = vector.shape_cast %6 : vector<32xf32> to vector<32x1xf32>
    %c0_i32 = arith.constant 0 : i32
    %8 = vector.broadcast %c0_i32 : i32 to vector<32x2xi32>
    %9 = arith.cmpi eq, %3, %8 : vector<32x2xi32>
    %10 = vector.shape_cast %7 : vector<32x1xf32> to vector<32x1xf32>
    %11 = vector.broadcast %10 : vector<32x1xf32> to vector<32x2xf32>
    %12 = arith.select %9, %11, %4 : vector<32x2xi1>, vector<32x2xf32>
    %13 = vector.extract_strided_slice %2 {offsets = [0, 256], sizes = [32, 256], strides = [1, 1]} : vector<32x512xf32> to vector<32x256xf32>
    %cst_5 = arith.constant dense<0xFF800000> : vector<32xf32>
    %14 = vector.multi_reduction <maximumf>, %13, %cst_5 [1] : vector<32x256xf32> to vector<32xf32>
    %15 = vector.shape_cast %14 : vector<32xf32> to vector<32x1xf32>
    %c1_i32 = arith.constant 1 : i32
    %16 = vector.broadcast %c1_i32 : i32 to vector<32x2xi32>
    %17 = arith.cmpi eq, %3, %16 : vector<32x2xi32>
    %18 = vector.shape_cast %15 : vector<32x1xf32> to vector<32x1xf32>
    %19 = vector.broadcast %18 : vector<32x1xf32> to vector<32x2xf32>
    %20 = arith.select %17, %19, %12 : vector<32x2xi1>, vector<32x2xf32>
    %c0_6 = arith.constant 0 : index
    %c0_7 = arith.constant 0 : index
    %21 = vector.load %arg3[%c0_6, %c0_7] : memref<32x1xf32, #tpu.memory_space<vmem>>, vector<32x1xf32>
    %22 = vector.broadcast %21 : vector<32x1xf32> to vector<32x2xf32>
    %23 = arith.addf %20, %22 : vector<32x2xf32>
    %cst_8 = arith.constant 0.000000e+00 : f32
    %24 = vector.broadcast %cst_8 : f32 to vector<32x2xf32>
    %25 = arith.maximumf %23, %24 : vector<32x2xf32>
    %c0_9 = arith.constant 0 : index
    %c0_10 = arith.constant 0 : index
    %26 = vector.load %arg4[%c0_9, %c0_10] : memref<128x32xf32, #tpu.memory_space<vmem>>, vector<128x32xf32>
    %cst_11 = arith.constant dense<0.000000e+00> : vector<128x2xf32>
    %27 = tpu.matmul %26, %25, %cst_11 {dimension_numbers = #tpu.dot_dimension_numbers<[1], [0], [0], [1], [0, 0, 1, 1], [], []>} : vector<128x32xf32>, vector<32x2xf32>, vector<128x2xf32> -> vector<128x2xf32>
    %c0_12 = arith.constant 0 : index
    %c0_13 = arith.constant 0 : index
    %28 = vector.load %arg5[%c0_12, %c0_13] : memref<128x1xf32, #tpu.memory_space<vmem>>, vector<128x1xf32>
    %29 = vector.broadcast %28 : vector<128x1xf32> to vector<128x2xf32>
    %30 = arith.addf %27, %29 : vector<128x2xf32>
    %c0_14 = arith.constant 0 : index
    %c0_15 = arith.constant 0 : index
    %31 = vector.load %arg6[%c0_14, %c0_15] : memref<128x2xf32, #tpu.memory_space<vmem>>, vector<128x2xf32>
    tpu.vector_store %arg6[%c0_14, %c0_15], %30 {strides = array<i32>} : memref<128x2xf32, #tpu.memory_space<vmem>>, vector<128x2xf32>,
    return
  }
  func.func @transform_0(%arg0: i32) -> (i32, i32) {
    %c0_i32 = arith.constant 0 : i32
    %c0_i32_0 = arith.constant 0 : i32
    %c0_i32_1 = arith.constant 0 : i32
    return %c0_i32, %c0_i32_0 : i32, i32
  }
  func.func @transform_1(%arg0: i32) -> (i32, i32) {
    %c0_i32 = arith.constant 0 : i32
    %c0_i32_0 = arith.constant 0 : i32
    %c0_i32_1 = arith.constant 0 : i32
    return %c0_i32, %c0_i32_0 : i32, i32
  }
  func.func @transform_2(%arg0: i32) -> (i32, i32) {
    %c0_i32 = arith.constant 0 : i32
    %c0_i32_0 = arith.constant 0 : i32
    %c0_i32_1 = arith.constant 0 : i32
    return %c0_i32, %c0_i32_0 : i32, i32
  }
  func.func @transform_3(%arg0: i32) -> (i32, i32) {
    %c0_i32 = arith.constant 0 : i32
    %c0_i32_0 = arith.constant 0 : i32
    %c0_i32_1 = arith.constant 0 : i32
    return %c0_i32, %c0_i32_0 : i32, i32
  }
  func.func @transform_4(%arg0: i32) -> (i32, i32) {
    %c0_i32 = arith.constant 0 : i32
    %c0_i32_0 = arith.constant 0 : i32
    %c0_i32_1 = arith.constant 0 : i32
    return %c0_i32, %c0_i32_0 : i32, i32
  }
  func.func @transform_5(%arg0: i32) -> (i32, i32) {
    %c0_i32 = arith.constant 0 : i32
    %c0_i32_0 = arith.constant 0 : i32
    %c0_i32_1 = arith.constant 0 : i32
    return %c0_i32, %c0_i32_0 : i32, i32
  }
}

</mosaic_0001>

<bundles_post_ra>
// kernel: tpu_custom_call.1
= control target key start
LH: loop header
LB: loop body
LE: loop exit
PB: predicated region body
PF: predicated region fallthrough
CT: control target
= control target key end

     0   :  { %vm102_vm0 = vcmask 1043456   ;;  %vm95_vm1 = vcmask 326656   ;;  %v588_v41 = vmov 0   ;;  %vm371_vm4 = vcmask 261120   ;;  %s887_s0 = inlined_call_operand.vmem [shape: bf16[40,512], index: 0, kind: input, shape index: {}]   ;;  %s888_s1 = inlined_call_operand.vmem [shape: bf16[32,40], index: 1, kind: input, shape index: {}]   ;;  %s889_s2 = inlined_call_operand.vmem [shape: f32[32,1], index: 2, kind: input, shape index: {}]   ;;  %s890_s4 = inlined_call_operand.vmem [shape: f32[128,1], index: 4, kind: input, shape index: {}]   ;;  %s891_s3 = inlined_call_operand.vmem [shape: f32[128,32], index: 3, kind: input, shape index: {}]   ;;  %s892_s5 = inlined_call_operand.vmem [shape: f32[128,2], index: 5, kind: output, shape index: {}]  }
   0x1   :  { %v33_v0 = vld [vmem:[%s887_s0 + $0x40] sm:$0xff]  ;;  %v34_v1 = vld [vmem:[%s887_s0 + $0x48] sm:$0xff]  ;;  %v578_v7 = vld [vmem:[%s887_s0 + $0x2c] sm:$0xf0]  ;;  %585 = vset.pattern.permute.xlu2 %v588_v41  ;;  %586 = vset.pattern.permute.xlu1 %v588_v41  ;;  %vm485_vm5 = vcmask 15360  }
   0x2   :  { %v71_v2 = vunpack.c.l.b16 %v33_v0  ;;  %v73_v3 = vunpack.c.l.b16 %v34_v1  ;;  %v532_v4 = vld [vmem:[%s887_s0 + $0x20] sm:$0xf]  ;;  %v540_v8 = vld [vmem:[%s887_s0 + $0x28] sm:$0xf]  ;;  %v579_v9 = vld [vmem:[%s887_s0 + $0x34] sm:$0xf0]  ;;  %v72_v10 = vunpack.c.h.b16 %v33_v0  ;;  %v74_v11 = vunpack.c.h.b16 %v34_v1  ;;  %587 = vset.pattern.permute.xlu0 %v588_v41 }
   0x3   :  { %v533_v14 = vor.u32 %v578_v7, %v532_v4  ;;  %v541_v15 = vor.u32 %v579_v9, %v540_v8  ;;  %v516_v16 = vld [vmem:[%s887_s0] sm:$0xf]  ;;  %v574_v17 = vld [vmem:[%s887_s0 + $0xc] sm:$0xf0]  ;;  %v524_v18 = vld [vmem:[%s887_s0 + $0x8] sm:$0xf] }
   0x4   :  { %v83_v5 = vpack.c.b16 %v71_v2, %v71_v2  ;;  %v85_v6 = vpack.c.b16 %v73_v3, %v73_v3  ;;  %v575_v19 = vld [vmem:[%s887_s0 + $0x14] sm:$0xf0]  ;;  %v84_v20 = vpack.c.b16 %v72_v10, %v72_v10  ;;  %v86_v21 = vpack.c.b16 %v74_v11, %v74_v11  ;;  %v576_v24 = vld [vmem:[%s887_s0 + $0x24] sm:$0xf]  ;;  %v534_v25 = vld [vmem:[%s887_s0 + $0x30] sm:$0xf0] }
   0x5   :  { %v517_v22 = vor.u32 %v574_v17, %v516_v16  ;;  %v525_v23 = vor.u32 %v575_v19, %v524_v18  ;;  %v577_v28 = vld [vmem:[%s887_s0 + $0x2c] sm:$0xf]  ;;  %v542_v29 = vld [vmem:[%s887_s0 + $0x38] sm:$0xf0]  ;;  %v570_v30 = vld [vmem:[%s888_s1] sm:$0xff]  ;;  %v537_v31 = vor.u32 %v576_v24, %v534_v25 }
   0x6   :  { %v104_v12 = vsel %vm102_vm0, %v83_v5, 0  ;;  %v110_v13 = vsel %vm102_vm0, %v85_v6, 0  ;;  %v107_v26 = vsel %vm102_vm0, %v84_v20, 0  ;;  %v113_v27 = vsel %vm102_vm0, %v86_v21, 0  ;;  %v572_v33 = vld [vmem:[%s887_s0 + $0x4] sm:$0xf] }
   0x7   :  { %120 = vmatpush.bf16.msra.mxu1 %v104_v12  ;;  %158 = vmatpush.bf16.msra.mxu3 %v110_v13  ;;  %v545_v32 = vor.u32 %v577_v28, %v542_v29  ;;  %v518_v34 = vld [vmem:[%s887_s0 + $0x10] sm:$0xf0]  ;;  %v573_v35 = vld [vmem:[%s887_s0 + $0xc] sm:$0xf]  ;;  %v526_v36 = vld [vmem:[%s887_s0 + $0x18] sm:$0xf0] }
   0x8   :  { %v521_v37 = vor.u32 %v572_v33, %v518_v34  ;;  %v529_v38 = vor.u32 %v573_v35, %v526_v36  ;;  %v571_v39 = vld [vmem:[%s888_s1 + $0x8] sm:$0xff]  ;;  %v230_v40 = vld [vmem:[%s889_s2 + $0x18] sm:$0xff]  ;;  %v229_v42 = vld [vmem:[%s889_s2 + $0x10] sm:$0xff] }
   0x9   :  { %248 = vperm.xlu2 %585, %v230_v40   ;;  %243 = vperm.xlu1 %586, %v229_v42   ;;  %v276_v2 = vld [vmem:[%s890_s4 + $0x8] sm:$0xff]  ;;  %v283_v5 = vld [vmem:[%s890_s4 + $0x40] sm:$0xff]  ;;  %v286_v8 = vld [vmem:[%s890_s4 + $0x58] sm:$0xff] }
   0xa   :  { %v280_v4 = vld [vmem:[%s890_s4 + $0x28] sm:$0xff]  ;;  %v227_v6 = vld [vmem:[%s889_s2] sm:$0xff]  ;;  %v281_v10 = vld [vmem:[%s890_s4 + $0x30] sm:$0xff] }
   0xb   :  { %121 = vmatpush.bf16.msra.mxu1 %v533_v14  ;;  %159 = vmatpush.bf16.msra.mxu3 %v541_v15  ;;  %v228_v7 = vld [vmem:[%s889_s2 + $0x8] sm:$0xff]  ;;  %v275_v9 = vld [vmem:[%s890_s4] sm:$0xff]  ;;  %v289_v11 = vld [vmem:[%s890_s4 + $0x70] sm:$0xff] }
   0xc   :  { %v277_v12 = vld [vmem:[%s890_s4 + $0x10] sm:$0xff]  ;;  %v284_v13 = vld [vmem:[%s890_s4 + $0x48] sm:$0xff]  ;;  %v278_v14 = vld [vmem:[%s890_s4 + $0x18] sm:$0xff] }
   0xd   :  { %v287_v15 = vld [vmem:[%s890_s4 + $0x60] sm:$0xff]  ;;  %v290_v17 = vld [vmem:[%s890_s4 + $0x78] sm:$0xff]  ;;  %v285_v19 = vld [vmem:[%s890_s4 + $0x50] sm:$0xff] }
   0xe   :  { %v279_v16 = vld [vmem:[%s890_s4 + $0x20] sm:$0xff]  ;;  %v282_v18 = vld [vmem:[%s890_s4 + $0x38] sm:$0xff]  ;;  %v288_v20 = vld [vmem:[%s890_s4 + $0x68] sm:$0xff] }
   0xf   :  { %122 = vmatpush.bf16.msra.mxu1 %v517_v22  ;;  %160 = vmatpush.bf16.msra.mxu3 %v525_v23 }
  0x12   :  { %546 = vmatmul.msk.bf16.vlgmr.msra.gmra.mxu1 %vm95_vm1, %v570_v30  ;;  %550 = vmatmul.msk.bf16.vlgmr.msra.gmra.mxu3 %vm95_vm1, %v570_v30 }
  0x13   :  { %139 = vmatpush.bf16.msrb.mxu1 %v107_v26  ;;  %177 = vmatpush.bf16.msrb.mxu3 %v113_v27  ;;  %v191_v26 = vlaneseq }
  0x15   :  { %v192_v28 = vand.u32 127, %v191_v26 }
  0x17   :  { %140 = vmatpush.bf16.msrb.mxu1 %v537_v31  ;;  %178 = vmatpush.bf16.msrb.mxu3 %v545_v32  ;;  %vm205_vm2 = vcmp.eq.s32.totalorder %v192_v28, 0  ;;  %vm222_vm3 = vcmp.eq.s32.totalorder %v192_v28, 1 }
  0x1b   :  { %141 = vmatpush.bf16.msrb.mxu1 %v521_v37  ;;  %179 = vmatpush.bf16.msrb.mxu3 %v529_v38 }
  0x22   :  { %547 = vmatmul.msk.bf16.gmra.mxu1 %vm95_vm1, %v571_v39  ;;  %551 = vmatmul.msk.bf16.gmra.mxu3 %vm95_vm1, %v571_v39 }
  0x32   :  { %548 = vmatmul.msk.bf16.vlgmr.msrb.gmra.mxu1 %vm95_vm1, %v570_v30  ;;  %552 = vmatmul.msk.bf16.vlgmr.msrb.gmra.mxu3 %vm95_vm1, %v570_v30 }
  0x42   :  { %549 = vmatmul.msk.bf16.gmra.mxu1 %vm95_vm1, %v571_v39  ;;  %553 = vmatmul.msk.bf16.gmra.mxu3 %vm95_vm1, %v571_v39 }
  0x63   :  { %v249_v34 = vpop.permute.xlu2 %248 }
  0x7b   :  { %v244_v23 = vpop.permute.xlu1 %243 }
  0x8f   :  { %v124_v43 = vpop.f32.mrf.mxu1 }
  0x95   :  { %v162_v44 = vpop.f32.mrf.mxu3 }
  0x97   :  { %v126_v45 = vpop.f32.mrf.mxu1 }
  0x9d   :  { %v164_v46 = vpop.f32.mrf.mxu3 }
  0x9f   :  { %v129_v47 = vpop.f32.mrf.mxu1 }
  0xa5   :  { %v167_v48 = vpop.f32.mrf.mxu3 }
  0xa7   :  { %v131_v49 = vpop.f32.mrf.mxu1 }
  0xad   :  { %v169_v50 = vpop.f32.mrf.mxu3 }
  0xaf   :  { %v143_v51 = vpop.f32.mrf.mxu1 }
  0xb0   :  { %v193_v52 = vmax.f32 %v124_v43, %v143_v51  ;;  %v259_v51 = vld [vmem:[%s891_s3] sm:$0xff] }
  0xb2   :  { %194 = vmax.xlane.f32.xlu0 %v193_v52  ;;  %v268_v52 = vld [vmem:[%s891_s3 + $0x48] sm:$0xff] }
  0xb5   :  { %v181_v53 = vpop.f32.mrf.mxu3 }
  0xb6   :  { %v210_v55 = vmax.f32 %v162_v44, %v181_v53  ;;  %v260_v53 = vld [vmem:[%s891_s3 + $0x8] sm:$0xff] }
  0xb7   :  { %v145_v54 = vpop.f32.mrf.mxu1 }
  0xb8   :  { %v196_v56 = vmax.f32 %v126_v45, %v145_v54  ;;  %v269_v54 = vld [vmem:[%s891_s3 + $0x50] sm:$0xff] }
  0xba   :  { %211 = vmax.xlane.f32.xlu0 %v210_v55  ;;  %197 = vmax.xlane.f32.xlu2 %v196_v56  ;;  %v261_v55 = vld [vmem:[%s891_s3 + $0x10] sm:$0xff]  ;;  %v270_v56 = vld [vmem:[%s891_s3 + $0x58] sm:$0xff] }
  0xbd   :  { %v183_v57 = vpop.f32.mrf.mxu3 }
  0xbe   :  { %v213_v59 = vmax.f32 %v164_v46, %v183_v57  ;;  %v262_v57 = vld [vmem:[%s891_s3 + $0x18] sm:$0xff] }
  0xbf   :  { %v148_v58 = vpop.f32.mrf.mxu1 }
  0xc0   :  { %v199_v60 = vmax.f32 %v129_v47, %v148_v58  ;;  %v271_v58 = vld [vmem:[%s891_s3 + $0x60] sm:$0xff] }
  0xc2   :  { %214 = vmax.xlane.f32.xlu0 %v213_v59  ;;  %200 = vmax.xlane.f32.xlu1 %v199_v60  ;;  %v263_v59 = vld [vmem:[%s891_s3 + $0x20] sm:$0xff]  ;;  %v272_v60 = vld [vmem:[%s891_s3 + $0x68] sm:$0xff] }
  0xc5   :  { %v186_v61 = vpop.f32.mrf.mxu3 }
  0xc6   :  { %v216_v63 = vmax.f32 %v167_v48, %v186_v61  ;;  %v264_v61 = vld [vmem:[%s891_s3 + $0x28] sm:$0xff] }
  0xc7   :  { %v150_v62 = vpop.f32.mrf.mxu1 }
  0xc8   :  { %v202_v0 = vmax.f32 %v131_v49, %v150_v62  ;;  %v273_v62 = vld [vmem:[%s891_s3 + $0x70] sm:$0xff] }
  0xca   :  { %217 = vmax.xlane.f32.xlu1 %v216_v63  ;;  %203 = vmax.xlane.f32.xlu0 %v202_v0  ;;  %v265_v63 = vld [vmem:[%s891_s3 + $0x30] sm:$0xff]  ;;  %v274_v0 = vld [vmem:[%s891_s3 + $0x78] sm:$0xff] }
  0xcd   :  { %v188_v1 = vpop.f32.mrf.mxu3 }
  0xce   :  { %v219_v3 = vmax.f32 %v169_v50, %v188_v1  ;;  %v266_v1 = vld [vmem:[%s891_s3 + $0x38] sm:$0xff] }
  0xd2   :  { %298 = vperm.xlu2 %585, %v276_v2   ;;  %220 = vmax.xlane.f32.xlu0 %v219_v3  ;;  %v267_v2 = vld [vmem:[%s891_s3 + $0x40] sm:$0xff] }
  0xda   :  { %318 = vperm.xlu2 %585, %v280_v4  }
  0xe2   :  { %333 = vperm.xlu2 %585, %v283_v5  }
  0xe3   :  { %233 = vperm.xlu1 %586, %v227_v6  }
  0xe6   :  { %238 = vperm.xlu0 %587, %v228_v7  }
  0xea   :  { %348 = vperm.xlu2 %585, %v286_v8  }
  0xeb   :  { %293 = vperm.xlu1 %586, %v275_v9  }
  0xee   :  { %323 = vperm.xlu0 %587, %v281_v10  }
  0xf2   :  { %363 = vperm.xlu2 %585, %v289_v11  }
  0xf3   :  { %303 = vperm.xlu1 %586, %v277_v12  }
  0xf6   :  { %338 = vperm.xlu0 %587, %v284_v13  }
  0xfb   :  { %308 = vperm.xlu1 %586, %v278_v14  }
  0xfe   :  { %353 = vperm.xlu0 %587, %v287_v15  }
 0x103   :  { %313 = vperm.xlu1 %586, %v279_v16  }
 0x106   :  { %368 = vperm.xlu0 %587, %v290_v17  }
 0x10b   :  { %328 = vperm.xlu1 %586, %v282_v18  }
 0x113   :  { %343 = vperm.xlu1 %586, %v285_v19  }
 0x11b   :  { %358 = vperm.xlu1 %586, %v288_v20  }
 0x125   :  { %v195_v21 = vpop.xlane.xlu0 %194 }
 0x126   :  { %v206_v42 = vsel %vm205_vm2, %v195_v21, 0.0 }
 0x12d   :  { %v212_v22 = vpop.xlane.xlu0 %211  ;;  %v198_v40 = vpop.xlane.xlu2 %197 }
 0x12e   :  { %v207_v43 = vsel %vm205_vm2, %v198_v40, 0.0  ;;  %v223_v44 = vsel %vm222_vm3, %v212_v22, %v206_v42 }
 0x135   :  { %v215_v24 = vpop.xlane.xlu0 %214  ;;  %v201_v25 = vpop.xlane.xlu1 %200 }
 0x136   :  { %v208_v30 = vsel %vm205_vm2, %v201_v25, 0.0  ;;  %v224_v45 = vsel %vm222_vm3, %v215_v24, %v207_v43  ;;  %v299_v6 = vpop.permute.xlu2 %298 }
 0x13d   :  { %v204_v27 = vpop.xlane.xlu0 %203  ;;  %v218_v29 = vpop.xlane.xlu1 %217 }
 0x13e   :  { %v225_v31 = vsel %vm222_vm3, %v218_v29, %v208_v30  ;;  %v209_v32 = vsel %vm205_vm2, %v204_v27, 0.0  ;;  %v319_v11 = vpop.permute.xlu2 %318 }
 0x13f   :  { %v253_v37 = vadd.f32 %v244_v23, %v225_v31 }
 0x141   :  { %v257_v39 = vmax.f32 %v253_v37, 0.0 }
 0x145   :  { %v221_v33 = vpop.xlane.xlu0 %220 }
 0x146   :  { %v226_v35 = vsel %vm222_vm3, %v221_v33, %v209_v32  ;;  %v334_v18 = vpop.permute.xlu2 %333 }
 0x147   :  { %v254_v36 = vadd.f32 %v249_v34, %v226_v35 }
 0x149   :  { %v258_v38 = vmax.f32 %v254_v36, 0.0 }
 0x14b   :  { %432 = vmatpush.msra.mxu0 %v258_v38  ;;  %580 = vmatpush.msra.mxu2 %v258_v38 }
 0x14d   :  { %433 = vmatpush.msra.mxu0 %v257_v39  ;;  %581 = vmatpush.msra.mxu2 %v257_v39 }
 0x14e   :  { %v349_v24 = vpop.permute.xlu2 %348 }
 0x155   :  { %v234_v41 = vpop.permute.xlu1 %233 }
 0x156   :  { %v251_v47 = vadd.f32 %v234_v41, %v223_v44  ;;  %v364_v39 = vpop.permute.xlu2 %363 }
 0x158   :  { %v239_v46 = vpop.permute.xlu0 %238  ;;  %v255_v50 = vmax.f32 %v251_v47, 0.0 }
 0x159   :  { %v252_v48 = vadd.f32 %v239_v46, %v224_v45 }
 0x15b   :  { %v256_v49 = vmax.f32 %v252_v48, 0.0 }
 0x15d   :  { %434 = vmatpush.msra.mxu0 %v256_v49  ;;  %582 = vmatpush.msra.mxu2 %v256_v49  ;;  %v294_v3 = vpop.permute.xlu1 %293 }
 0x15f   :  { %435 = vmatpush.msra.mxu0 %v255_v50  ;;  %583 = vmatpush.msra.mxu2 %v255_v50 }
 0x160   :  { %554 = vmatmul.msk.f32.vlgmr.msra.gmra.mxu0 %vm371_vm4, %v259_v51  ;;  %563 = vmatmul.msk.f32.vlgmr.msra.gmra.mxu2 %vm371_vm4, %v268_v52  ;;  %v324_v8 = vpop.permute.xlu0 %323 }
 0x165   :  { %v304_v4 = vpop.permute.xlu1 %303 }
 0x168   :  { %555 = vmatmul.msk.f32.gmra.mxu0 %vm371_vm4, %v260_v53  ;;  %564 = vmatmul.msk.f32.gmra.mxu2 %vm371_vm4, %v269_v54  ;;  %v339_v13 = vpop.permute.xlu0 %338 }
 0x16d   :  { %v309_v5 = vpop.permute.xlu1 %308 }
 0x170   :  { %556 = vmatmul.msk.f32.gmra.mxu0 %vm371_vm4, %v261_v55  ;;  %565 = vmatmul.msk.f32.gmra.mxu2 %vm371_vm4, %v270_v56  ;;  %v354_v29 = vpop.permute.xlu0 %353 }
 0x175   :  { %v314_v7 = vpop.permute.xlu1 %313 }
 0x178   :  { %557 = vmatmul.msk.f32.gmra.mxu0 %vm371_vm4, %v262_v57  ;;  %566 = vmatmul.msk.f32.gmra.mxu2 %vm371_vm4, %v271_v58  ;;  %v369_v44 = vpop.permute.xlu0 %368 }
 0x17d   :  { %v329_v12 = vpop.permute.xlu1 %328 }
 0x180   :  { %558 = vmatmul.msk.f32.gmra.mxu0 %vm371_vm4, %v263_v59  ;;  %567 = vmatmul.msk.f32.gmra.mxu2 %vm371_vm4, %v272_v60 }
 0x185   :  { %v344_v19 = vpop.permute.xlu1 %343 }
 0x188   :  { %559 = vmatmul.msk.f32.gmra.mxu0 %vm371_vm4, %v264_v61  ;;  %568 = vmatmul.msk.f32.gmra.mxu2 %vm371_vm4, %v273_v62 }
 0x18d   :  { %v359_v34 = vpop.permute.xlu1 %358 }
 0x190   :  { %560 = vmatmul.msk.f32.gmra.mxu0 %vm371_vm4, %v265_v63  ;;  %569 = vmatmul.msk.f32.gmra.mxu2 %vm371_vm4, %v274_v0 }
 0x198   :  { %561 = vmatmul.msk.f32.gmra.mxu0 %vm371_vm4, %v266_v1 }
 0x1a0   :  { %562 = vmatmul.msk.f32.gmra.mxu0 %vm371_vm4, %v267_v2 }
 0x1dd   :  { %v437_v9 = vpop.f32.mrf.mxu0 }
 0x1de   :  { %v438_v10 = vadd.f32 %v437_v9, %v294_v3 }
 0x1e0   :  { %486 = vst.msk [vmem:[%s892_s5] sm:$0xff] %vm485_vm5, %v438_v10 }
 0x1e3   :  { %v464_v14 = vpop.f32.mrf.mxu2 }
 0x1e4   :  { %v465_v15 = vadd.f32 %v464_v14, %v339_v13 }
 0x1e5   :  { %v440_v16 = vpop.f32.mrf.mxu0 }
 0x1e6   :  { %495 = vst.msk [vmem:[%s892_s5 + $0x48] sm:$0xff] %vm485_vm5, %v465_v15  ;;  %v441_v17 = vadd.f32 %v440_v16, %v299_v6 }
 0x1e8   :  { %487 = vst.msk [vmem:[%s892_s5 + $0x8] sm:$0xff] %vm485_vm5, %v441_v17 }
 0x1eb   :  { %v467_v20 = vpop.f32.mrf.mxu2 }
 0x1ec   :  { %v468_v21 = vadd.f32 %v467_v20, %v344_v19 }
 0x1ed   :  { %v443_v22 = vpop.f32.mrf.mxu0 }
 0x1ee   :  { %496 = vst.msk [vmem:[%s892_s5 + $0x50] sm:$0xff] %vm485_vm5, %v468_v21  ;;  %v444_v23 = vadd.f32 %v443_v22, %v304_v4 }
 0x1f0   :  { %488 = vst.msk [vmem:[%s892_s5 + $0x10] sm:$0xff] %vm485_vm5, %v444_v23 }
 0x1f3   :  { %v470_v25 = vpop.f32.mrf.mxu2 }
 0x1f4   :  { %v471_v26 = vadd.f32 %v470_v25, %v349_v24 }
 0x1f5   :  { %v446_v27 = vpop.f32.mrf.mxu0 }
 0x1f6   :  { %497 = vst.msk [vmem:[%s892_s5 + $0x58] sm:$0xff] %vm485_vm5, %v471_v26  ;;  %v447_v28 = vadd.f32 %v446_v27, %v309_v5 }
 0x1f8   :  { %489 = vst.msk [vmem:[%s892_s5 + $0x18] sm:$0xff] %vm485_vm5, %v447_v28 }
 0x1fb   :  { %v473_v30 = vpop.f32.mrf.mxu2 }
 0x1fc   :  { %v474_v31 = vadd.f32 %v473_v30, %v354_v29 }
 0x1fd   :  { %v449_v32 = vpop.f32.mrf.mxu0 }
 0x1fe   :  { %498 = vst.msk [vmem:[%s892_s5 + $0x60] sm:$0xff] %vm485_vm5, %v474_v31  ;;  %v450_v33 = vadd.f32 %v449_v32, %v314_v7 }
 0x200   :  { %490 = vst.msk [vmem:[%s892_s5 + $0x20] sm:$0xff] %vm485_vm5, %v450_v33 }
 0x203   :  { %v476_v35 = vpop.f32.mrf.mxu2 }
 0x204   :  { %v477_v36 = vadd.f32 %v476_v35, %v359_v34 }
 0x205   :  { %v452_v37 = vpop.f32.mrf.mxu0 }
 0x206   :  { %499 = vst.msk [vmem:[%s892_s5 + $0x68] sm:$0xff] %vm485_vm5, %v477_v36  ;;  %v453_v38 = vadd.f32 %v452_v37, %v319_v11 }
 0x208   :  { %491 = vst.msk [vmem:[%s892_s5 + $0x28] sm:$0xff] %vm485_vm5, %v453_v38 }
 0x20b   :  { %v479_v40 = vpop.f32.mrf.mxu2 }
 0x20c   :  { %v480_v41 = vadd.f32 %v479_v40, %v364_v39 }
 0x20d   :  { %v455_v42 = vpop.f32.mrf.mxu0 }
 0x20e   :  { %500 = vst.msk [vmem:[%s892_s5 + $0x70] sm:$0xff] %vm485_vm5, %v480_v41  ;;  %v456_v43 = vadd.f32 %v455_v42, %v324_v8 }
 0x210   :  { %492 = vst.msk [vmem:[%s892_s5 + $0x30] sm:$0xff] %vm485_vm5, %v456_v43 }
 0x213   :  { %v482_v45 = vpop.f32.mrf.mxu2 }
 0x214   :  { %v483_v46 = vadd.f32 %v482_v45, %v369_v44 }
 0x215   :  { %v458_v47 = vpop.f32.mrf.mxu0 }
 0x216   :  { %501 = vst.msk [vmem:[%s892_s5 + $0x78] sm:$0xff] %vm485_vm5, %v483_v46  ;;  %v459_v48 = vadd.f32 %v458_v47, %v329_v12 }
 0x218   :  { %493 = vst.msk [vmem:[%s892_s5 + $0x38] sm:$0xff] %vm485_vm5, %v459_v48 }
 0x21d   :  { %v461_v49 = vpop.f32.mrf.mxu0 }
 0x21e   :  { %v462_v50 = vadd.f32 %v461_v49, %v334_v18 }
 0x220   :  { %494 = vst.msk [vmem:[%s892_s5 + $0x40] sm:$0xff] %vm485_vm5, %v462_v50 }

</bundles_post_ra>
